<compile_context>
chip_gen: v7x
topology: tpu7x:2x2x1
jax: 0.10.0
libtpu: 0.0.40
codegen_flags: <defaults>
</compile_context>

<pallas_src>
import functools

import numpy as np
import jax
import jax.numpy as jnp
from jax.experimental import pallas as pl
from jax.experimental.pallas import tpu as pltpu


# --------------------------------------------------------------------------- #
# Helpers
# --------------------------------------------------------------------------- #
def _sublane(dtype):
    itemsize = jnp.dtype(dtype).itemsize
    return {4: 8, 2: 16, 1: 32}.get(itemsize, 8)


def _round_up(x, m):
    return ((x + m - 1) // m) * m


def _default_vmem_limit():
    """<=32 MiB always; also never more than half the chip's physical VMEM."""
    limit = 32 * 1024 * 1024
    try:
        cap = pltpu.get_tpu_info().vmem_capacity_bytes
        limit = min(limit, max(cap // 2, 8 * 1024 * 1024))
    except Exception:
        pass
    return limit


def _fold_ok_on_this_chip():
    """Gate the folded (MXU averaging) path off on chips with a slow f32 MXU."""
    try:
        kind = jax.devices()[0].device_kind.lower()
    except Exception:
        return True
    slow = ("v5 lite", "v5lite", "v5e", "v4", "v3", "v2")
    return not any(t in kind for t in slow)


@functools.lru_cache(maxsize=None)
def _avg_matrix(d_model, fold):
    """Block-diagonal (n, n) matrix with 1/d_model inside each segment block."""
    n = d_model * fold
    seg = np.arange(n) // d_model
    avg = (seg[:, None] == seg[None, :]).astype(np.float32) / float(d_model)
    return jnp.asarray(avg)


# --------------------------------------------------------------------------- #
# Kernels
# --------------------------------------------------------------------------- #
def _norm_kernel(x_ref, gamma_ref, beta_ref, o_ref, *, eps):
    """LayerNorm over the last axis; block's last dim is the full d_model.

    Two-pass statistics: mean first, then variance of the centered values
    (numerically robust, same op count as the single-pass form).
    """
    x = x_ref[...].astype(jnp.float32)                      # (block_rows, d_model)
    d = x.shape[-1]
    inv_d = jnp.float32(1.0 / d)
    mean = jnp.sum(x, axis=-1, keepdims=True) * inv_d
    xc = x - mean
    var = jnp.sum(xc * xc, axis=-1, keepdims=True) * inv_d  # biased (unbiased=False)
    inv = jax.lax.rsqrt(var + jnp.float32(eps))             # EUP slot -> ~free
    gamma = gamma_ref[...].astype(jnp.float32)              # (1, d_model)
    beta = beta_ref[...].astype(jnp.float32)
    o_ref[...] = (xc * inv * gamma + beta).astype(o_ref.dtype)


def _norm_folded_kernel(x_ref, gamma_ref, beta_ref, avg_ref, o_ref, *, eps):
    """LayerNorm with `fold` logical rows packed along the lane axis (n = 128).

    avg_ref is an (n, n) block-diagonal matrix with 1/d_model inside each
    d_model x d_model diagonal block: x @ avg gives the per-lane segment mean
    already broadcast back to lanes (MXU does reduce + broadcast). Two-pass.
    """
    x = x_ref[...].astype(jnp.float32)                      # (block_rows, n)
    avg = avg_ref[...]                                      # (n, n) f32
    mean = jnp.dot(x, avg, preferred_element_type=jnp.float32)
    xc = x - mean
    var = jnp.dot(xc * xc, avg, preferred_element_type=jnp.float32)
    inv = jax.lax.rsqrt(var + jnp.float32(eps))
    gamma = gamma_ref[...].astype(jnp.float32)              # (1, n) = gamma tiled
    beta = beta_ref[...].astype(jnp.float32)
    o_ref[...] = (xc * inv * gamma + beta).astype(o_ref.dtype)


# --------------------------------------------------------------------------- #
# Wrapper
# --------------------------------------------------------------------------- #
def norm(x, gamma, beta, eps=1e-6, *, block_rows=None, vmem_limit_bytes=None,
         min_grid_steps=4):
    """LayerNorm over the last axis, matching the PyTorch Norm module."""
    orig_shape = x.shape
    d_model = orig_shape[-1]
    rows = 1
    for s in orig_shape[:-1]:
        rows *= s
    x2 = x.reshape(rows, d_model)
    gamma1 = gamma.reshape(-1)
    beta1 = beta.reshape(-1)

    if vmem_limit_bytes is None:
        vmem_limit_bytes = _default_vmem_limit()

    # Fold logical rows into the lane axis (to exactly 128 lanes) when
    # d_model < 128 so stores are lane-dense instead of masked partial stores.
    # Gated off on chips with a slow f32 MXU path (v5e and older).
    fold = 1
    if (d_model < 128 and (128 % d_model == 0)
            and (rows % (128 // d_model) == 0) and _fold_ok_on_this_chip()):
        fold = 128 // d_model

    n_lanes = fold * d_model                # == 128 exactly in the folded path
    n_rows = rows // fold
    xk = x2.reshape(n_rows, n_lanes)
    if fold == 1:
        gk = gamma1.reshape(1, n_lanes)
        bk = beta1.reshape(1, n_lanes)
    else:
        gk = jnp.tile(gamma1, fold).reshape(1, n_lanes)
        bk = jnp.tile(beta1, fold).reshape(1, n_lanes)

    # --- row-tile sizing -----------------------------------------------------
    sub = _sublane(x.dtype)                 # 8 f32 / 16 bf16 / 32 int8
    io_bytes = jnp.dtype(x.dtype).itemsize
    if block_rows is None:
        # Live VMEM per row: 2x double-buffered input + 2x double-buffered
        # output (4*io_bytes) plus ~3 f32 temporaries kept live in the kernel
        # (x cast, centered, normalized) -> +12 bytes/elem.
        per_row = n_lanes * (4 * io_bytes + 12)
        budget = vmem_limit_bytes // 2      # headroom for compiler scratch
        block_rows = budget // max(per_row, 1)
    # Keep at least `min_grid_steps` grid steps so the parallel axis can be
    # sharded across both TensorCores on v7x (and the pipeline has >1 stage).
    steps_cap = _round_up(pl.cdiv(n_rows, max(min_grid_steps, 1)), sub)
    block_rows = min(block_rows, max(steps_cap, sub))
    block_rows = min(max(block_rows, sub), 16384)
    block_rows = max(sub, (block_rows // sub) * sub)
    block_rows = min(block_rows, _round_up(n_rows, sub))

    grid = (pl.cdiv(n_rows, block_rows),)   # no host-side padding; tail masked

    # --- cost estimate (advisory) ---------------------------------------------
    flops = 7 * rows * d_model
    bytes_accessed = 2 * rows * d_model * io_bytes + 2 * d_model * 4
    if fold > 1:
        flops += 4 * n_rows * n_lanes * n_lanes      # two (B,n)x(n,n) matmuls
        bytes_accessed += n_lanes * n_lanes * 4      # avg matrix, read once
    cost = pl.CostEstimate(flops=flops, transcendentals=rows,
                           bytes_accessed=bytes_accessed)

    row_spec = pl.BlockSpec((block_rows, n_lanes), lambda i: (i, 0))
    vec_spec = pl.BlockSpec((1, n_lanes), lambda i: (0, 0))

    if fold == 1:
        kernel = functools.partial(_norm_kernel, eps=eps)
        in_specs = [row_spec, vec_spec, vec_spec]
        args = (xk, gk, bk)
    else:
        avg = _avg_matrix(d_model, fold)    # cached across calls
        kernel = functools.partial(_norm_folded_kernel, eps=eps)
        in_specs = [row_spec, vec_spec, vec_spec,
                    pl.BlockSpec((n_lanes, n_lanes), lambda i: (0, 0))]
        args = (xk, gk, bk, avg)

    out = pl.pallas_call(
        kernel,
        out_shape=jax.ShapeDtypeStruct((n_rows, n_lanes), x.dtype),
        grid_spec=pltpu.PrefetchScalarGridSpec(
            num_scalar_prefetch=0,
            grid=grid,
            in_specs=in_specs,
            out_specs=row_spec,
        ),
        compiler_params=pltpu.CompilerParams(
            dimension_semantics=("parallel",),
            vmem_limit_bytes=vmem_limit_bytes,
        ),
        cost_estimate=cost,
    )(*args)

    # TODO(synk): if a trace shows exposed input DMA (most likely on v7x),
    # add pipeline_mode=pl.Buffered(3) to the x input row_spec only.
    return out.reshape(orig_shape)


# --------------------------------------------------------------------------- #
# Reference + demo
# --------------------------------------------------------------------------- #
def _reference_norm(x, gamma, beta, eps=1e-6):
    x = x.astype(jnp.float32)
    mean = jnp.mean(x, axis=-1, keepdims=True)
    var = jnp.mean((x - mean) ** 2, axis=-1, keepdims=True)
    x_hat = (x - mean) / jnp.sqrt(var + eps)
    return gamma * x_hat + beta


if __name__ == "__main__":
    key = jax.random.PRNGKey(0)
    k1, k2, k3, k4 = jax.random.split(key, 4)

    # Case 1: module-spec shapes (d_model < 128 -> folded, lane-dense path on
    # v6e/v7x; masked-lane fallback on v5e). Default-initialized params.
    batch, seq, d_model = 2, 8, 32
    gamma = jnp.ones((d_model,), dtype=jnp.float32)   # nn.Parameter(torch.ones)
    beta = jnp.zeros((d_model,), dtype=jnp.float32)   # nn.Parameter(torch.zeros)
    x = jax.random.normal(k1, (batch, seq, d_model), dtype=jnp.float32)

    y = jax.block_until_ready(norm(x, gamma, beta))
    y_ref = _reference_norm(x, gamma, beta)
    assert y.shape == x.shape
    assert jnp.allclose(y, y_ref, atol=1e-5, rtol=1e-5), "mismatch vs reference (d=32)"

    # Case 2: d_model >= 128 (in-row reduction path), non-divisible rows
    # (masked tail blocks), non-trivial affine parameters.
    d2 = 256
    gamma2 = 1.0 + 0.1 * jax.random.normal(k2, (d2,), dtype=jnp.float32)
    beta2 = 0.1 * jax.random.normal(k3, (d2,), dtype=jnp.float32)
    x2 = jax.random.normal(k4, (3, 7, d2), dtype=jnp.float32) + 3.0  # offset: tests 2-pass var
    y2 = jax.block_until_ready(norm(x2, gamma2, beta2))
    y2_ref = _reference_norm(x2, gamma2, beta2)
    assert jnp.allclose(y2, y2_ref, atol=1e-5, rtol=1e-5), "mismatch vs reference (d=256)"

    print("KERNEL_OK")
</pallas_src>

<mosaic_0001>
module attributes {stable_mosaic.version = 11 : i64} {
  func.func @_norm_folded_kernel(%arg0: i32, %arg1: memref<8x128xf32, #tpu.memory_space<vmem>>, %arg2: memref<1x128xf32, #tpu.memory_space<vmem>>, %arg3: memref<1x128xf32, #tpu.memory_space<vmem>>, %arg4: memref<128x128xf32, #tpu.memory_space<vmem>>, %arg5: memref<8x128xf32, #tpu.memory_space<vmem>>) attributes {dimension_semantics = [#tpu.dimension_semantics<parallel>], iteration_bounds = array<i64: 1>, scalar_prefetch = 0 : i64, scratch_operands = 0 : i64, tpu.core_type = #tpu.core_type<tc>, window_params = [{transform_indices = @transform_0, window_bounds = array<i64: 8, 128>}, {pipeline_mode = #tpu.pipeline_mode<synchronous>, transform_indices = @transform_1, window_bounds = array<i64: 1, 128>}, {pipeline_mode = #tpu.pipeline_mode<synchronous>, transform_indices = @transform_2, window_bounds = array<i64: 1, 128>}, {pipeline_mode = #tpu.pipeline_mode<synchronous>, transform_indices = @transform_3, window_bounds = array<i64: 128, 128>}, {transform_indices = @transform_4, window_bounds = array<i64: 8, 128>}]} {
    %c0 = arith.constant 0 : index
    %c0_0 = arith.constant 0 : index
    %0 = vector.load %arg1[%c0, %c0_0] : memref<8x128xf32, #tpu.memory_space<vmem>>, vector<8x128xf32>
    %c0_1 = arith.constant 0 : index
    %c0_2 = arith.constant 0 : index
    %1 = vector.load %arg4[%c0_1, %c0_2] : memref<128x128xf32, #tpu.memory_space<vmem>>, vector<128x128xf32>
    %cst = arith.constant dense<0.000000e+00> : vector<8x128xf32>
    %2 = tpu.matmul %0, %1, %cst {dimension_numbers = #tpu.dot_dimension_numbers<[1], [0], [0], [1], [0, 0, 1, 1], [], []>} : vector<8x128xf32>, vector<128x128xf32>, vector<8x128xf32> -> vector<8x128xf32>
    %3 = arith.subf %0, %2 : vector<8x128xf32>
    %4 = arith.mulf %3, %3 : vector<8x128xf32>
    %cst_3 = arith.constant dense<0.000000e+00> : vector<8x128xf32>
    %5 = tpu.matmul %4, %1, %cst_3 {dimension_numbers = #tpu.dot_dimension_numbers<[1], [0], [0], [1], [0, 0, 1, 1], [], []>} : vector<8x128xf32>, vector<128x128xf32>, vector<8x128xf32> -> vector<8x128xf32>
    %cst_4 = arith.constant 9.99999997E-7 : f32
    %6 = vector.broadcast %cst_4 : f32 to vector<8x128xf32>
    %7 = arith.addf %5, %6 : vector<8x128xf32>
    %8 = math.rsqrt %7 : vector<8x128xf32>
    %c0_5 = arith.constant 0 : index
    %c0_6 = arith.constant 0 : index
    %9 = vector.load %arg2[%c0_5, %c0_6] : memref<1x128xf32, #tpu.memory_space<vmem>>, vector<1x128xf32>
    %c0_7 = arith.constant 0 : index
    %c0_8 = arith.constant 0 : index
    %10 = vector.load %arg3[%c0_7, %c0_8] : memref<1x128xf32, #tpu.memory_space<vmem>>, vector<1x128xf32>
    %11 = arith.mulf %3, %8 : vector<8x128xf32>
    %12 = vector.broadcast %9 : vector<1x128xf32> to vector<8x128xf32>
    %13 = arith.mulf %11, %12 : vector<8x128xf32>
    %14 = vector.broadcast %10 : vector<1x128xf32> to vector<8x128xf32>
    %15 = arith.addf %13, %14 : vector<8x128xf32>
    %c0_9 = arith.constant 0 : index
    %c0_10 = arith.constant 0 : index
    %16 = vector.load %arg5[%c0_9, %c0_10] : memref<8x128xf32, #tpu.memory_space<vmem>>, vector<8x128xf32>
    tpu.vector_store %arg5[%c0_9, %c0_10], %15 {strides = array<i32>} : memref<8x128xf32, #tpu.memory_space<vmem>>, vector<8x128xf32>,
    return
  }
  func.func @transform_0(%arg0: i32) -> (i32, i32) {
    %c0_i32 = arith.constant 0 : i32
    %c0_i32_0 = arith.constant 0 : i32
    return %arg0, %c0_i32 : i32, i32
  }
  func.func @transform_1(%arg0: i32) -> (i32, i32) {
    %c0_i32 = arith.constant 0 : i32
    %c0_i32_0 = arith.constant 0 : i32
    %c0_i32_1 = arith.constant 0 : i32
    return %c0_i32, %c0_i32_0 : i32, i32
  }
  func.func @transform_2(%arg0: i32) -> (i32, i32) {
    %c0_i32 = arith.constant 0 : i32
    %c0_i32_0 = arith.constant 0 : i32
    %c0_i32_1 = arith.constant 0 : i32
    return %c0_i32, %c0_i32_0 : i32, i32
  }
  func.func @transform_3(%arg0: i32) -> (i32, i32) {
    %c0_i32 = arith.constant 0 : i32
    %c0_i32_0 = arith.constant 0 : i32
    %c0_i32_1 = arith.constant 0 : i32
    return %c0_i32, %c0_i32_0 : i32, i32
  }
  func.func @transform_4(%arg0: i32) -> (i32, i32) {
    %c0_i32 = arith.constant 0 : i32
    %c0_i32_0 = arith.constant 0 : i32
    return %arg0, %c0_i32 : i32, i32
  }
}

</mosaic_0001>

<bundles_post_ra>
// kernel: tpu_custom_call.1
= control target key start
LH: loop header
LB: loop body
LE: loop exit
PB: predicated region body
PF: predicated region fallthrough
CT: control target
= control target key end

     0   :  { %9 = vsyncpa [#allocation3], 0  ;;  %s563_s0 = inlined_call_operand.hbm [shape: f32[4,128], index: 0, kind: input, shape index: {}]   ;;  %s564_s1 = inlined_call_operand.vmem [shape: f32[1,128], index: 1, kind: input, shape index: {}]   ;;  %s565_s2 = inlined_call_operand.vmem [shape: f32[1,128], index: 2, kind: input, shape index: {}]   ;;  %s566_s3 = inlined_call_operand.hbm [shape: f32[128,128], index: 3, kind: input, shape index: {}]   ;;  %s567_s4 = inlined_call_operand.hbm [shape: f32[4,128], index: 4, kind: output, shape index: {}]  }
   0x1   :  { %10 = vsyncpa [#allocation6], 0 }
   0x2   :  { %11 = vsyncpa [#allocation4], 0 }
   0x3   :  { %16 = vsyncadd [#allocation3], 64  ;;  %s480_s15 = smov [#allocation2]   ;;  %s408_s19 = scalar_lea.hbm %s563_s0, 64 }
   0x4   :  { %s17_s16 = sshll.u32 %s480_s15, 4  ;;  %p409_p0 = scmp.ne.s32.totalorder %s563_s0, %s408_s19  ;;  %s18_s16 = int_to_ptr.vmem [resolvable:$true] %s17_s16 }
   0x5   :  { %p412_p1 = scmp.lt.u32.totalorder %s408_s19, %s563_s0 }
   0x7   :  { %p414_p2 = pnand %p412_p1, %p409_p0 }
   0x9   :  { %417 = shalt.err (!%p414_p2)
}
   0xa   :  { %s418_s24 = scalar_lea.vmem %s18_s16, 64  ;;  %s422_s25 = scalar_lea.vmem %s18_s16, 128 }
   0xb   :  { %p419_p3 = scmp.ne.s32.totalorder %s18_s16, %s418_s24  ;;  %p423_p4 = scmp.lt.s32.totalorder %s18_s16, %s18_s16 }
   0xc   :  { %p424_p5 = scmp.lt.s32.totalorder %s422_s25, %s418_s24 }
   0xe   :  { %p425_p6 = por %p424_p5, %p423_p4 }
  0x10   :  { %p426_p7 = pnand %p425_p6, %p419_p3 }
  0x12   :  { %429 = shalt.err (!%p426_p7)
}
  0x13   :  { %s481_s26 = smov 64   ;;  %s482_s27 = smov 4  }
  0x14   :  { %23 = dma.hbm_to_vmem [thread:$0]  %s563_s0, 64, %s18_s16, [#allocation3], %s481_s26, %s481_s26, %s482_s27  }
  0x15   :  { %s483_s30 = smov [#allocation5]   ;;  %s430_s8 = scalar_lea.hbm %s566_s3, 2048 }
  0x16   :  { %s33_s5 = sshll.u32 %s483_s30, 4  ;;  %p431_p8 = scmp.ne.s32.totalorder %s566_s3, %s430_s8  ;;  %s34_s5 = int_to_ptr.vmem [resolvable:$true] %s33_s5 }
  0x17   :  { %p434_p9 = scmp.lt.u32.totalorder %s430_s8, %s566_s3 }
  0x19   :  { %p436_p10 = pnand %p434_p9, %p431_p8 }
  0x1b   :  { %439 = shalt.err (!%p436_p10)
}
  0x1c   :  { %s440_s13 = scalar_lea.vmem %s34_s5, 2048  ;;  %p445_p12 = scmp.lt.s32.totalorder %s34_s5, %s34_s5 }
  0x1d   :  { %p441_p11 = scmp.ne.s32.totalorder %s34_s5, %s440_s13  ;;  %p446_p13 = scmp.lt.s32.totalorder %s440_s13, %s440_s13 }
  0x1f   :  { %p447_p0 = por %p446_p13, %p445_p12 }
  0x21   :  { %p448_p1 = pnand %p447_p0, %p441_p11 }
  0x23   :  { %451 = shalt.err (!%p448_p1)
}
  0x24   :  { %s484_s0 = smov 128   ;;  %s485_s14 = smov 8  }
  0x25   :  { %39 = dma.hbm_to_vmem [thread:$0]  %s566_s3, 2048, %s34_s5, [#allocation6], %s484_s0, %s484_s0, %s485_s14  }
  0x26   :  { %474 = dma.done.wait [#allocation3], 128  }
  0x27   :  { %475 = vsyncadd [#allocation3], 4294967168 }
  0x28   :  { %476 = dma.done.wait [#allocation6], 2048  }
  0x29   :  { %477 = vsyncadd [#allocation6], 4294965248  ;;  %v486_v0 = vmov 0.0|0.0   ;;  %vm487_vm0 = vmmov 0   ;;  %v488_v1 = vmov 0.0   ;;  %v47_v2 = vld [vmem:[#allocation5] sm:$0xff] }
  0x2a   :  { %348 = vmatprep.subr.bf16.mxu0 %v486_v0  ;;  %310 = vmatprep.mubr.msk.f32.mxu0 %vm487_vm0, %v488_v1  ;;  %v48_v3 = vld [vmem:[#allocation5 + $0x8] sm:$0xff]  ;;  %v49_v4 = vld [vmem:[#allocation5 + $0x10] sm:$0xff]  ;;  %v50_v6 = vld [vmem:[#allocation5 + $0x18] sm:$0xff] }
  0x2b   :  { %372 = vmatprep.subr.bf16.mxu1 %v486_v0  ;;  %345 = vmatprep.mubr.msk.f32.mxu1 %vm487_vm0, %v488_v1  ;;  %v349_v5 = vpack.c.bf16 %v48_v3, %v47_v2  ;;  %v352_v7 = vpack.c.bf16 %v50_v6, %v49_v4  ;;  %v51_v8 = vld [vmem:[#allocation5 + $0x20] sm:$0xff]  ;;  %v52_v9 = vld [vmem:[#allocation5 + $0x28] sm:$0xff]  ;;  %v53_v11 = vld [vmem:[#allocation5 + $0x30] sm:$0xff] }
  0x2c   :  { %v355_v10 = vpack.c.bf16 %v52_v9, %v51_v8  ;;  %v54_v12 = vld [vmem:[#allocation5 + $0x38] sm:$0xff]  ;;  %v55_v14 = vld [vmem:[#allocation5 + $0x40] sm:$0xff]  ;;  %v56_v15 = vld [vmem:[#allocation5 + $0x48] sm:$0xff] }
  0x2d   :  { %350 = vmatpush3.bf16.msra.mxu0 %v349_v5  ;;  %374 = vmatpush3.bf16.msra.mxu1 %v349_v5  ;;  %v358_v13 = vpack.c.bf16 %v54_v12, %v53_v11  ;;  %v361_v16 = vpack.c.bf16 %v56_v15, %v55_v14  ;;  %v57_v17 = vld [vmem:[#allocation5 + $0x50] sm:$0xff]  ;;  %v58_v18 = vld [vmem:[#allocation5 + $0x58] sm:$0xff]  ;;  %v59_v20 = vld [vmem:[#allocation5 + $0x60] sm:$0xff] }
  0x2e   :  { %351 = vmatprep.subr.bf16.mxu0 %v486_v0  ;;  %375 = vmatprep.subr.bf16.mxu1 %v486_v0  ;;  %v364_v19 = vpack.c.bf16 %v58_v18, %v57_v17  ;;  %v60_v21 = vld [vmem:[#allocation5 + $0x68] sm:$0xff]  ;;  %v61_v23 = vld [vmem:[#allocation5 + $0x70] sm:$0xff]  ;;  %v62_v24 = vld [vmem:[#allocation5 + $0x78] sm:$0xff] }
  0x2f   :  { %v367_v22 = vpack.c.bf16 %v60_v21, %v59_v20  ;;  %v370_v25 = vpack.c.bf16 %v62_v24, %v61_v23  ;;  %v46_v26 = vld [vmem:[#allocation2] sm:$0xff] }
  0x30   :  { %v242_v35 = vld [vmem:[%s564_s1] ss:$0 sm:$0xff] }
  0x31   :  { %353 = vmatpush3.bf16.msra.mxu0 %v352_v7  ;;  %377 = vmatpush3.bf16.msra.mxu1 %v352_v7  ;;  %v243_v37 = vld [vmem:[%s565_s2] ss:$0 sm:$0xff] }
  0x32   :  { %354 = vmatprep.subr.bf16.mxu0 %v486_v0  ;;  %378 = vmatprep.subr.bf16.mxu1 %v486_v0 }
  0x35   :  { %356 = vmatpush3.bf16.msra.mxu0 %v355_v10  ;;  %380 = vmatpush3.bf16.msra.mxu1 %v355_v10 }
  0x36   :  { %357 = vmatprep.subr.bf16.mxu0 %v486_v0  ;;  %381 = vmatprep.subr.bf16.mxu1 %v486_v0 }
  0x39   :  { %359 = vmatpush3.bf16.msra.mxu0 %v358_v13  ;;  %383 = vmatpush3.bf16.msra.mxu1 %v358_v13 }
  0x3a   :  { %360 = vmatprep.subr.bf16.mxu0 %v486_v0  ;;  %384 = vmatprep.subr.bf16.mxu1 %v486_v0 }
  0x3d   :  { %362 = vmatpush3.bf16.msra.mxu0 %v361_v16  ;;  %386 = vmatpush3.bf16.msra.mxu1 %v361_v16 }
  0x3e   :  { %363 = vmatprep.subr.bf16.mxu0 %v486_v0  ;;  %387 = vmatprep.subr.bf16.mxu1 %v486_v0 }
  0x41   :  { %365 = vmatpush3.bf16.msra.mxu0 %v364_v19  ;;  %389 = vmatpush3.bf16.msra.mxu1 %v364_v19 }
  0x42   :  { %366 = vmatprep.subr.bf16.mxu0 %v486_v0  ;;  %390 = vmatprep.subr.bf16.mxu1 %v486_v0 }
  0x45   :  { %368 = vmatpush3.bf16.msra.mxu0 %v367_v22  ;;  %392 = vmatpush3.bf16.msra.mxu1 %v367_v22 }
  0x46   :  { %369 = vmatprep.subr.bf16.mxu0 %v486_v0  ;;  %393 = vmatprep.subr.bf16.mxu1 %v486_v0 }
  0x49   :  { %371 = vmatpush3.bf16.msra.mxu0 %v370_v25  ;;  %395 = vmatpush3.bf16.msra.mxu1 %v370_v25 }
  0x4c   :  { %311 = vmatmul.mubr.f32.vlgmr.msra.gmra.mrb[0].mxu0 %v46_v26 }
 0x11f   :  { %v129_v27 = vpop.f32.mrb[0].mxu0 }
 0x120   :  { %v133_v28 = vsub.f32 %v46_v26, %v129_v27  ;;  %v312_v29 = vpop.f32.mrb[1].mxu0 }
 0x122   :  { %v134_v30 = vmul.f32 %v133_v28, %v133_v28 }
 0x124   :  { %346 = vmatmul.mubr.f32.vlgmr.msra.gmra.mrb[0].mxu1 %v134_v30 }
 0x1f7   :  { %v201_v31 = vpop.f32.mrb[0].mxu1 }
 0x1f8   :  { %v202_v32 = vadd.f32 1e-06, %v201_v31  ;;  %v347_v33 = vpop.f32.mrb[1].mxu1 }
 0x1fa   :  { %406 = vrsqrt.f32 %v202_v32 }
 0x204   :  { %v407_v34 = vpop.eup %406 }
 0x205   :  { %v208_v36 = vmul.f32 %v407_v34, %v133_v28 }
 0x207   :  { %v215_v38 = vmul.f32 %v242_v35, %v208_v36 }
 0x209   :  { %v222_v39 = vadd.f32 %v243_v37, %v215_v38 }
 0x20b   :  { %223 = vst [vmem:[#allocation7] sm:$0xff] %v222_v39 }
 0x20c   :  { %228 = vsyncadd [#allocation4], 64  ;;  %s489_s20 = smov [#allocation7]  }
 0x20d   :  { %s229_s21 = sshll.u32 %s489_s20, 4  ;;  %s230_s21 = int_to_ptr.vmem [resolvable:$true] %s229_s21 }
 0x20e   :  { %s452_s22 = scalar_lea.vmem %s230_s21, 64  ;;  %s456_s23 = scalar_lea.vmem %s230_s21, 128 }
 0x20f   :  { %p453_p2 = scmp.ne.s32.totalorder %s230_s21, %s452_s22  ;;  %p457_p3 = scmp.lt.s32.totalorder %s230_s21, %s230_s21 }
 0x210   :  { %p458_p4 = scmp.lt.s32.totalorder %s456_s23, %s452_s22 }
 0x212   :  { %p459_p5 = por %p458_p4, %p457_p3 }
 0x214   :  { %p460_p6 = pnand %p459_p5, %p453_p2 }
 0x216   :  { %463 = shalt.err (!%p460_p6)
}
 0x217   :  { %s464_s25 = scalar_lea.hbm %s567_s4, 64 }
 0x218   :  { %p465_p7 = scmp.ne.s32.totalorder %s567_s4, %s464_s25  ;;  %p468_p8 = scmp.lt.u32.totalorder %s464_s25, %s567_s4 }
 0x21a   :  { %p470_p9 = pnand %p468_p8, %p465_p7 }
 0x21c   :  { %473 = shalt.err (!%p470_p9)
}
 0x21d   :  { %235 = dma.vmem_to_hbm [thread:$0]  %s230_s21, 64, %s567_s4, [#allocation4], %s481_s26, %s481_s26, %s482_s27  }
 0x21e   :  { %478 = dma.done.wait [#allocation4], 128  }
 0x21f   :  { %479 = vsyncadd [#allocation4], 4294967168 }
 0x220   :  { %239 = vsyncpa [#allocation3], 1 }
 0x221   :  { %240 = vsyncpa [#allocation6], 1 }
 0x222   :  { %241 = vsyncpa [#allocation4], 1 }

</bundles_post_ra>
